<compile_context>
chip_gen: v7x
topology: tpu7x:2x2x1
jax: 0.10.0
libtpu: 0.0.40
codegen_flags: <defaults>
</compile_context>

<pallas_src>
import math
import functools

import jax
import jax.numpy as jnp
from jax.experimental import pallas as pl
from jax.experimental.pallas import tpu as pltpu


def _round_up(x, m):
    return ((x + m - 1) // m) * m


def _hardware_budgets():
    """(per-input block byte budget, scoped VMEM limit) for this TPU generation."""
    cap = None
    try:
        cap = getattr(pltpu.get_tpu_info(), "vmem_capacity_bytes", None)
    except Exception:
        cap = None
    if cap is None:
        cap = 64 * 1024 * 1024                       # conservative (v7x-class)
    if cap >= 100 * 1024 * 1024:                     # 128 MiB parts: v5e / v6e
        # 2 inputs x 2 pipeline buffers x 12 MiB = 48 MiB <= 64 MiB scoped limit.
        return 12 * 1024 * 1024, 64 * 1024 * 1024
    # 64 MiB parts (v7x): 2 x 2 x 5 MiB = 20 MiB <= 30 MiB scoped limit.
    return 5 * 1024 * 1024, 30 * 1024 * 1024


def _select_row_tile(n_rows, bytes_per_row, block_budget):
    """Row-tile for a (n_rows, <=128-lane-padded) block, sized purely by bytes.

    Returns the full extent when everything fits, otherwise a multiple of 128
    rows (lane-dense output stores) big enough to amortize the ~0.35us/step
    overhead, capped so the grid keeps >=16 steps for v7x's two TensorCores.
    """
    rows_by_vmem = max(8, block_budget // max(1, bytes_per_row))
    if n_rows <= rows_by_vmem:
        return n_rows                                # full extent: always legal
    tile = rows_by_vmem
    if tile >= 128:
        tile = (tile // 128) * 128
        if pl.cdiv(n_rows, tile) < 16:
            cand = _round_up(pl.cdiv(n_rows, 16), 128)
            floor = _round_up(max(1, (512 * 1024) // bytes_per_row), 128)
            tile = min(tile, max(cand, floor, 128))
    else:
        tile = max(8, (tile // 8) * 8)               # only reachable with tiny budgets
    return tile


# --------------------------------------------------------------------------
# Kernels
# --------------------------------------------------------------------------
def _rowsum_kernel(t1_ref, t2_ref, o_ref, *, inv_scale):
    # Multiply in the input dtype (no pre-upcast), accumulate the reduction in f32.
    res = jnp.sum(t1_ref[...] * t2_ref[...], axis=-1, dtype=jnp.float32)
    if inv_scale != 1.0:
        res = res * inv_scale
    o_ref[...] = res.astype(o_ref.dtype)


def _packed_kernel(t1_ref, t2_ref, sel_ref, o_ref, *, inv_scale):
    # Blocks are (tile, 128): g = 128 // D logical rows packed per vreg row.
    # The grouped lane reduction is a tiny matmul with a constant 0/1
    # selection matrix (128, g) on the otherwise idle MXU.
    prod = t1_ref[...] * t2_ref[...]          # product in the input dtype
    sel = sel_ref[...]                        # bf16, exactly 0/1
    if prod.dtype == jnp.bfloat16:
        res = jnp.dot(prod, sel, preferred_element_type=jnp.float32)
    else:
        # Split the f32 product into 3 bf16 pieces so every MXU pass is exact
        # (sel is exactly representable); recovers ~f32 accuracy regardless of
        # the backend's default matmul precision.
        p32 = prod.astype(jnp.float32)
        hi = p32.astype(jnp.bfloat16)
        r1 = p32 - hi.astype(jnp.float32)
        mid = r1.astype(jnp.bfloat16)
        lo = (r1 - mid.astype(jnp.float32)).astype(jnp.bfloat16)
        res = (jnp.dot(hi, sel, preferred_element_type=jnp.float32)
               + jnp.dot(mid, sel, preferred_element_type=jnp.float32)
               + jnp.dot(lo, sel, preferred_element_type=jnp.float32))
    if inv_scale != 1.0:
        res = res * inv_scale
    o_ref[...] = res.astype(o_ref.dtype)


def _dtiled_kernel(t1_ref, t2_ref, o_ref, acc_ref, *, inv_scale, d_total,
                   tile_d, needs_mask):
    k = pl.program_id(1)

    @pl.when(k == 0)
    def _init():
        acc_ref[...] = jnp.zeros_like(acc_ref)

    prod = t1_ref[...] * t2_ref[...]
    if needs_mask:
        # Final D tile is ragged: zero the out-of-range lanes (their contents
        # are unspecified) instead of padding the inputs in HBM.
        col = k * tile_d + jax.lax.broadcasted_iota(jnp.int32, prod.shape, 1)
        prod = jnp.where(col < d_total, prod, jnp.zeros_like(prod))
    acc_ref[...] += jnp.sum(prod, axis=-1, dtype=jnp.float32)

    @pl.when(k == pl.num_programs(1) - 1)
    def _finalize():
        res = acc_ref[...]
        if inv_scale != 1.0:
            res = res * inv_scale
        o_ref[...] = res.astype(o_ref.dtype)


# --------------------------------------------------------------------------
# Wrapper
# --------------------------------------------------------------------------
def dot_product_similarity(tensor_1, tensor_2, scale_output=False,
                           *, block_budget_bytes=None, vmem_limit_bytes=None):
    """Pallas equivalent of DotProductSimilarity.forward.

    tensor_1, tensor_2: same-shaped arrays (..., D).
    returns: (...,) array, (t1 * t2).sum(-1) [/ sqrt(D) if scale_output].
    """
    assert tensor_1.shape == tensor_2.shape
    *lead, D = tensor_1.shape
    N = 1
    for dim in lead:
        N *= dim
    dtype = tensor_1.dtype
    itemsize = jnp.dtype(dtype).itemsize
    inv_scale = 1.0 / math.sqrt(D) if scale_output else 1.0

    hw_budget, hw_limit = _hardware_budgets()
    block_budget = block_budget_bytes or hw_budget
    vmem_limit = vmem_limit_bytes or hw_limit

    t1 = tensor_1.reshape(N, D)
    t2 = tensor_2.reshape(N, D)

    cost = pl.CostEstimate(flops=2 * N * D, transcendentals=0,
                           bytes_accessed=2 * N * D * itemsize + N * itemsize)
    d_lanes = _round_up(D, 128)   # VMEM lane padding of the last dim

    # ---- Path 1: small D -> pack g = 128 // D logical rows per 128-lane row.
    group = 128 // D if D < 128 else 0
    if (group > 0 and 128 % D == 0 and N % group == 0
            and jnp.issubdtype(dtype, jnp.floating)
            and 8 * 128 * itemsize <= block_budget):
        rows = N // group
        t1p = t1.reshape(rows, 128)        # free: rows stay contiguous in HBM
        t2p = t2.reshape(rows, 128)
        sel = (jnp.arange(128)[:, None] // D
               == jnp.arange(group)[None, :]).astype(jnp.bfloat16)   # (128, g)
        tile = _select_row_tile(rows, 128 * itemsize, block_budget)
        out = pl.pallas_call(
            functools.partial(_packed_kernel, inv_scale=inv_scale),
            out_shape=jax.ShapeDtypeStruct((rows, group), dtype),
            grid_spec=pltpu.PrefetchScalarGridSpec(
                num_scalar_prefetch=0,
                grid=(pl.cdiv(rows, tile),),
                in_specs=[
                    pl.BlockSpec((tile, 128), lambda i: (i, 0)),
                    pl.BlockSpec((tile, 128), lambda i: (i, 0)),
                    pl.BlockSpec((128, group), lambda i: (0, 0)),
                ],
                out_specs=pl.BlockSpec((tile, group), lambda i: (i, 0)),
            ),
            compiler_params=pltpu.CompilerParams(
                dimension_semantics=("parallel",),
                vmem_limit_bytes=vmem_limit,
            ),
            cost_estimate=cost,
        )(t1p, t2p, sel)
        return out.reshape(tuple(lead))

    # ---- Path 2: huge D -> tile the reduction axis with an f32 accumulator.
    if 128 * d_lanes * itemsize > block_budget:
        tile_d = max(128, ((block_budget // (128 * itemsize)) // 128) * 128)
        tile_d = min(tile_d, d_lanes)
        k_steps = pl.cdiv(D, tile_d)
        needs_mask = (D % tile_d) != 0
        rows_by_vmem = max(128, block_budget // (tile_d * itemsize))
        tile_m = N if N <= rows_by_vmem else (rows_by_vmem // 128) * 128
        out = pl.pallas_call(
            functools.partial(_dtiled_kernel, inv_scale=inv_scale, d_total=D,
                              tile_d=tile_d, needs_mask=needs_mask),
            out_shape=jax.ShapeDtypeStruct((N,), dtype),
            grid_spec=pltpu.PrefetchScalarGridSpec(
                num_scalar_prefetch=0,
                grid=(pl.cdiv(N, tile_m), k_steps),
                in_specs=[
                    pl.BlockSpec((tile_m, tile_d), lambda i, k: (i, k)),
                    pl.BlockSpec((tile_m, tile_d), lambda i, k: (i, k)),
                ],
                out_specs=pl.BlockSpec((tile_m,), lambda i, k: (i,)),
                scratch_shapes=[pltpu.VMEM((tile_m,), jnp.float32)],
            ),
            compiler_params=pltpu.CompilerParams(
                dimension_semantics=("parallel", "arbitrary"),
                vmem_limit_bytes=vmem_limit,
            ),
            cost_estimate=cost,
        )(t1, t2)
        return out.reshape(tuple(lead))

    # ---- Path 3: general case -- one row-tile grid axis, D loaded whole.
    tile = _select_row_tile(N, d_lanes * itemsize, block_budget)
    out = pl.pallas_call(
        functools.partial(_rowsum_kernel, inv_scale=inv_scale),
        out_shape=jax.ShapeDtypeStruct((N,), dtype),
        grid_spec=pltpu.PrefetchScalarGridSpec(
            num_scalar_prefetch=0,
            grid=(pl.cdiv(N, tile),),
            in_specs=[
                pl.BlockSpec((tile, D), lambda i: (i, 0)),
                pl.BlockSpec((tile, D), lambda i: (i, 0)),
            ],
            out_specs=pl.BlockSpec((tile,), lambda i: (i,)),
        ),
        compiler_params=pltpu.CompilerParams(
            dimension_semantics=("parallel",),
            vmem_limit_bytes=vmem_limit,
        ),
        cost_estimate=cost,
    )(t1, t2)
    return out.reshape(tuple(lead))


if __name__ == "__main__":
    key = jax.random.PRNGKey(0)
    k1, k2 = jax.random.split(key)

    # Module-implied small shapes: (batch, seq, hidden), reduced over hidden.
    B, S, D = 2, 8, 32
    t1 = jax.random.normal(k1, (B, S, D), dtype=jnp.float32)
    t2 = jax.random.normal(k2, (B, S, D), dtype=jnp.float32)

    out = dot_product_similarity(t1, t2, scale_output=False)       # packed small-D path
    out_scaled = dot_product_similarity(t1, t2, scale_output=True)
    jax.block_until_ready((out, out_scaled))

    ref = jnp.sum(t1 * t2, axis=-1)
    assert out.shape == (B, S)
    assert jnp.allclose(out, ref, atol=1e-5)
    assert jnp.allclose(out_scaled, ref / math.sqrt(D), atol=1e-5)

    # Packed path with several row tiles and a ragged final block (no padding).
    ka, kb = jax.random.split(k2)
    p1 = jax.random.normal(ka, (520, 32), dtype=jnp.float32)
    p2 = jax.random.normal(kb, (520, 32), dtype=jnp.float32)
    out_p = dot_product_similarity(p1, p2, block_budget_bytes=64 * 1024)
    jax.block_until_ready(out_p)
    assert jnp.allclose(out_p, jnp.sum(p1 * p2, axis=-1), atol=1e-5)

    # General (unpacked) path, D >= 128, ragged final row block.
    kc, kd = jax.random.split(ka)
    u1 = jax.random.normal(kc, (300, 160), dtype=jnp.float32)
    u2 = jax.random.normal(kd, (300, 160), dtype=jnp.float32)
    out_u = dot_product_similarity(u1, u2, block_budget_bytes=128 * 1024)
    jax.block_until_ready(out_u)
    assert jnp.allclose(out_u, jnp.sum(u1 * u2, axis=-1), atol=1e-4)

    # Large-D tiled-reduction path (forced via a tiny block budget), including
    # the masked ragged final D tile (200 % 128 != 0).
    ke, kf = jax.random.split(kc)
    v1 = jax.random.normal(ke, (3, 5, 200), dtype=jnp.float32)
    v2 = jax.random.normal(kf, (3, 5, 200), dtype=jnp.float32)
    out_v = dot_product_similarity(v1, v2, scale_output=True,
                                   block_budget_bytes=4096)
    jax.block_until_ready(out_v)
    assert out_v.shape == (3, 5)
    assert jnp.allclose(out_v, jnp.sum(v1 * v2, axis=-1) / math.sqrt(200),
                        atol=1e-4)

    print("KERNEL_OK")
</pallas_src>

<mosaic_0001>
module attributes {stable_mosaic.version = 11 : i64} {
  func.func @_packed_kernel(%arg0: i32, %arg1: memref<4x128xf32, #tpu.memory_space<vmem>>, %arg2: memref<4x128xf32, #tpu.memory_space<vmem>>, %arg3: memref<128x4xbf16, #tpu.memory_space<vmem>>, %arg4: memref<4x4xf32, #tpu.memory_space<vmem>>) attributes {dimension_semantics = [#tpu.dimension_semantics<parallel>], iteration_bounds = array<i64: 1>, scalar_prefetch = 0 : i64, scratch_operands = 0 : i64, tpu.core_type = #tpu.core_type<tc>, window_params = [{transform_indices = @transform_0, window_bounds = array<i64: 4, 128>}, {transform_indices = @transform_1, window_bounds = array<i64: 4, 128>}, {pipeline_mode = #tpu.pipeline_mode<synchronous>, transform_indices = @transform_2, window_bounds = array<i64: 128, 4>}, {transform_indices = @transform_3, window_bounds = array<i64: 4, 4>}]} {
    %c0 = arith.constant 0 : index
    %c0_0 = arith.constant 0 : index
    %0 = vector.load %arg1[%c0, %c0_0] : memref<4x128xf32, #tpu.memory_space<vmem>>, vector<4x128xf32>
    %c0_1 = arith.constant 0 : index
    %c0_2 = arith.constant 0 : index
    %1 = vector.load %arg2[%c0_1, %c0_2] : memref<4x128xf32, #tpu.memory_space<vmem>>, vector<4x128xf32>
    %2 = arith.mulf %0, %1 : vector<4x128xf32>
    %c0_3 = arith.constant 0 : index
    %c0_4 = arith.constant 0 : index
    %3 = vector.load %arg3[%c0_3, %c0_4] : memref<128x4xbf16, #tpu.memory_space<vmem>>, vector<128x4xbf16>
    %4 = arith.truncf %2 : vector<4x128xf32> to vector<4x128xbf16>
    %5 = arith.extf %4 : vector<4x128xbf16> to vector<4x128xf32>
    %6 = arith.subf %2, %5 : vector<4x128xf32>
    %7 = arith.truncf %6 : vector<4x128xf32> to vector<4x128xbf16>
    %8 = arith.extf %7 : vector<4x128xbf16> to vector<4x128xf32>
    %9 = arith.subf %6, %8 : vector<4x128xf32>
    %10 = arith.truncf %9 : vector<4x128xf32> to vector<4x128xbf16>
    %cst = arith.constant dense<0.000000e+00> : vector<4x4xf32>
    %11 = tpu.matmul %4, %3, %cst {dimension_numbers = #tpu.dot_dimension_numbers<[1], [0], [0], [1], [0, 0, 1, 1], [], []>} : vector<4x128xbf16>, vector<128x4xbf16>, vector<4x4xf32> -> vector<4x4xf32>
    %cst_5 = arith.constant dense<0.000000e+00> : vector<4x4xf32>
    %12 = tpu.matmul %7, %3, %cst_5 {dimension_numbers = #tpu.dot_dimension_numbers<[1], [0], [0], [1], [0, 0, 1, 1], [], []>} : vector<4x128xbf16>, vector<128x4xbf16>, vector<4x4xf32> -> vector<4x4xf32>
    %13 = arith.addf %11, %12 : vector<4x4xf32>
    %cst_6 = arith.constant dense<0.000000e+00> : vector<4x4xf32>
    %14 = tpu.matmul %10, %3, %cst_6 {dimension_numbers = #tpu.dot_dimension_numbers<[1], [0], [0], [1], [0, 0, 1, 1], [], []>} : vector<4x128xbf16>, vector<128x4xbf16>, vector<4x4xf32> -> vector<4x4xf32>
    %15 = arith.addf %13, %14 : vector<4x4xf32>
    %c0_7 = arith.constant 0 : index
    %c0_8 = arith.constant 0 : index
    %16 = vector.load %arg4[%c0_7, %c0_8] : memref<4x4xf32, #tpu.memory_space<vmem>>, vector<4x4xf32>
    tpu.vector_store %arg4[%c0_7, %c0_8], %15 {strides = array<i32>} : memref<4x4xf32, #tpu.memory_space<vmem>>, vector<4x4xf32>,
    return
  }
  func.func @transform_0(%arg0: i32) -> (i32, i32) {
    %c0_i32 = arith.constant 0 : i32
    %c0_i32_0 = arith.constant 0 : i32
    return %arg0, %c0_i32 : i32, i32
  }
  func.func @transform_1(%arg0: i32) -> (i32, i32) {
    %c0_i32 = arith.constant 0 : i32
    %c0_i32_0 = arith.constant 0 : i32
    return %arg0, %c0_i32 : i32, i32
  }
  func.func @transform_2(%arg0: i32) -> (i32, i32) {
    %c0_i32 = arith.constant 0 : i32
    %c0_i32_0 = arith.constant 0 : i32
    %c0_i32_1 = arith.constant 0 : i32
    return %c0_i32, %c0_i32_0 : i32, i32
  }
  func.func @transform_3(%arg0: i32) -> (i32, i32) {
    %c0_i32 = arith.constant 0 : i32
    %c0_i32_0 = arith.constant 0 : i32
    return %arg0, %c0_i32 : i32, i32
  }
}

</mosaic_0001>

<bundles_post_ra>
// kernel: tpu_custom_call.1
= control target key start
LH: loop header
LB: loop body
LE: loop exit
PB: predicated region body
PF: predicated region fallthrough
CT: control target
= control target key end

     0   :  { %v362_v1 = vmov 0.0   ;;  %vm363_vm0 = vmmov 0   ;;  %s457_s0 = inlined_call_operand.vmem [shape: f32[4,128], index: 0, kind: input, shape index: {}]   ;;  %s458_s1 = inlined_call_operand.vmem [shape: f32[4,128], index: 1, kind: input, shape index: {}]   ;;  %s459_s2 = inlined_call_operand.vmem [shape: bf16[128,4], index: 2, kind: input, shape index: {}]   ;;  %s460_s3 = inlined_call_operand.hbm [shape: f32[4,4], index: 3, kind: output, shape index: {}]  }
   0x1   :  { %v330_v0 = vld [vmem:[%s459_s2] sm:$0xff]   ;;  %282 = vmatprep.subr.bf16.mxu0 %v362_v1  ;;  %262 = vmatprep.subr.bf16.mxu1 %v362_v1  ;;  %v331_v2 = vld [vmem:[%s459_s2 + $0x8] sm:$0xff]   ;;  %v332_v3 = vld [vmem:[%s459_s2 + $0x10] sm:$0xff]  }
   0x2   :  { %283 = vmatpush3.bf16.msra.mxu0 %v330_v0  ;;  %263 = vmatpush3.bf16.msra.mxu1 %v330_v0 }
   0x3   :  { %284 = vmatprep.subr.bf16.mxu0 %v362_v1  ;;  %298 = vmatprep.mubr.msk.bf16.mxu0 %vm363_vm0, %v362_v1 }
   0x4   :  { %264 = vmatprep.subr.bf16.mxu1 %v362_v1  ;;  %278 = vmatprep.mubr.msk.bf16.mxu1 %vm363_vm0, %v362_v1 }
   0x6   :  { %285 = vmatpush3.bf16.msra.mxu0 %v331_v2  ;;  %265 = vmatpush3.bf16.msra.mxu1 %v331_v2 }
   0x7   :  { %286 = vmatprep.subr.bf16.mxu0 %v362_v1  ;;  %266 = vmatprep.subr.bf16.mxu1 %v362_v1 }
   0x8   :  { %8 = vsyncpa [#allocation3], 0  ;;  %v333_v4 = vld [vmem:[%s459_s2 + $0x18] sm:$0xff]   ;;  %v334_v5 = vld [vmem:[%s459_s2 + $0x20] sm:$0xff]   ;;  %vm211_vm1 = vcmask 27648  }
   0x9   :  { %v16_v6 = vld [vmem:[%s457_s0] sm:$0xf]  ;;  %v335_v9 = vld [vmem:[%s459_s2 + $0x28] sm:$0xff]   ;;  %v336_v11 = vld [vmem:[%s459_s2 + $0x30] sm:$0xff]  }
   0xa   :  { %287 = vmatpush3.bf16.msra.mxu0 %v332_v3  ;;  %267 = vmatpush3.bf16.msra.mxu1 %v332_v3  ;;  %v17_v7 = vld [vmem:[%s458_s1] sm:$0xf]  ;;  %v337_v13 = vld [vmem:[%s459_s2 + $0x38] sm:$0xff]   ;;  %s364_s2 = smov [#allocation2]  }
   0xb   :  { %288 = vmatprep.subr.bf16.mxu0 %v362_v1  ;;  %268 = vmatprep.subr.bf16.mxu1 %v362_v1  ;;  %v18_v8 = vmul.f32 %v17_v7, %v16_v6  ;;  %s219_s30 = sshll.u32 %s364_s2, 4  ;;  %s220_s30 = int_to_ptr.vmem [resolvable:$true] %s219_s30 }
   0xc   :  { %s338_s4 = scalar_lea.vmem %s220_s30, 64  ;;  %p343_p1 = scmp.lt.s32.totalorder %s220_s30, %s220_s30 }
   0xd   :  { %v35_v10 = vpack.c.bf16 %v18_v8, %v18_v8  ;;  %p339_p0 = scmp.ne.s32.totalorder %s220_s30, %s338_s4  ;;  %p344_p2 = scmp.lt.s32.totalorder %s338_s4, %s338_s4 }
   0xe   :  { %289 = vmatpush3.bf16.msra.mxu0 %v333_v4  ;;  %269 = vmatpush3.bf16.msra.mxu1 %v333_v4 }
   0xf   :  { %290 = vmatprep.subr.bf16.mxu0 %v362_v1  ;;  %270 = vmatprep.subr.bf16.mxu1 %v362_v1  ;;  %v36_v12 = vunpack.c.l.bf16 %v35_v10  ;;  %p345_p3 = por %p344_p2, %p343_p1 }
  0x11   :  { %v37_v14 = vsub.f32 %v18_v8, %v36_v12  ;;  %p346_p4 = pnand %p345_p3, %p339_p0 }
  0x12   :  { %291 = vmatpush3.bf16.msra.mxu0 %v334_v5  ;;  %271 = vmatpush3.bf16.msra.mxu1 %v334_v5 }
  0x13   :  { %292 = vmatprep.subr.bf16.mxu0 %v362_v1  ;;  %272 = vmatprep.subr.bf16.mxu1 %v362_v1  ;;  %v38_v15 = vpack.c.bf16 %v37_v14, %v37_v14 }
  0x15   :  { %v39_v16 = vunpack.c.l.bf16 %v38_v15 }
  0x16   :  { %293 = vmatpush3.bf16.msra.mxu0 %v335_v9  ;;  %273 = vmatpush3.bf16.msra.mxu1 %v335_v9 }
  0x17   :  { %294 = vmatprep.subr.bf16.mxu0 %v362_v1  ;;  %274 = vmatprep.subr.bf16.mxu1 %v362_v1  ;;  %v40_v17 = vsub.f32 %v37_v14, %v39_v16 }
  0x19   :  { %v41_v18 = vpack.c.bf16 %v40_v17, %v40_v17 }
  0x1a   :  { %295 = vmatpush3.bf16.msra.mxu0 %v336_v11  ;;  %275 = vmatpush3.bf16.msra.mxu1 %v336_v11 }
  0x1b   :  { %296 = vmatprep.subr.bf16.mxu0 %v362_v1  ;;  %276 = vmatprep.subr.bf16.mxu1 %v362_v1 }
  0x1e   :  { %297 = vmatpush3.bf16.msra.mxu0 %v337_v13  ;;  %277 = vmatpush3.bf16.msra.mxu1 %v337_v13 }
  0x1f   :  { %302 = vmatprep.subr.bf16.mxu0 %v362_v1 }
  0x21   :  { %299 = vmatmul.mubr.bf16.vlgmr.msra.gmra.mrb[0].mxu0 %v35_v10  ;;  %279 = vmatmul.mubr.bf16.vlgmr.msra.gmra.mrb[0].mxu1 %v38_v15 }
  0x22   :  { %303 = vmatpush3.bf16.msra.mxu0 %v330_v0  ;;  %318 = vmatprep.mubr.msk.bf16.mxu0 %vm363_vm0, %v362_v1 }
  0x23   :  { %304 = vmatprep.subr.bf16.mxu0 %v362_v1 }
  0x26   :  { %305 = vmatpush3.bf16.msra.mxu0 %v331_v2 }
  0x27   :  { %306 = vmatprep.subr.bf16.mxu0 %v362_v1 }
  0x2a   :  { %307 = vmatpush3.bf16.msra.mxu0 %v332_v3 }
  0x2b   :  { %308 = vmatprep.subr.bf16.mxu0 %v362_v1 }
  0x2e   :  { %309 = vmatpush3.bf16.msra.mxu0 %v333_v4 }
  0x2f   :  { %310 = vmatprep.subr.bf16.mxu0 %v362_v1 }
  0x32   :  { %311 = vmatpush3.bf16.msra.mxu0 %v334_v5 }
  0x33   :  { %312 = vmatprep.subr.bf16.mxu0 %v362_v1 }
  0x36   :  { %313 = vmatpush3.bf16.msra.mxu0 %v335_v9 }
  0x37   :  { %314 = vmatprep.subr.bf16.mxu0 %v362_v1 }
  0x3a   :  { %315 = vmatpush3.bf16.msra.mxu0 %v336_v11 }
  0x3b   :  { %316 = vmatprep.subr.bf16.mxu0 %v362_v1 }
  0x3e   :  { %317 = vmatpush3.bf16.msra.mxu0 %v337_v13 }
  0x41   :  { %319 = vmatmul.mubr.bf16.vlgmr.msra.gmra.mrb[0].mxu0 %v41_v18 }
  0xf4   :  { %v124_v19 = vpop.f32.mrb[0].mxu1 }
  0xf5   :  { %v280_v20 = vpop.f32.mrb[1].mxu1 }
  0xf6   :  { %v127_v21 = vpop.f32.mrb[2].mxu1 }
  0xf7   :  { %v281_v22 = vpop.f32.mrb[3].mxu1 }
 0x114   :  { %v204_v23 = vpop.f32.mrb[0].mxu0 }
 0x115   :  { %v322_v24 = vadd.f32 %v204_v23, %v124_v19  ;;  %v320_v25 = vpop.f32.mrb[1].mxu0 }
 0x116   :  { %v207_v26 = vpop.f32.mrb[2].mxu0 }
 0x117   :  { %v321_v27 = vpop.f32.mrb[3].mxu0  ;;  %212 = vst.msk [vmem:[#allocation2] sm:$0xf] %vm211_vm1, %v322_v24 }
 0x118   :  { %349 = shalt.err (!%p346_p4)
}
 0x119   :  { %s350_s7 = scalar_lea.hbm %s460_s3, 64 }
 0x11a   :  { %p351_p5 = scmp.ne.s32.totalorder %s460_s3, %s350_s7  ;;  %p354_p6 = scmp.lt.u32.totalorder %s350_s7, %s460_s3 }
 0x11c   :  { %p356_p7 = pnand %p354_p6, %p351_p5 }
 0x11e   :  { %359 = shalt.err (!%p356_p7)
}
 0x11f   :  { %222 = dma.vmem_to_hbm [thread:$0]  %s220_s30, 64, %s460_s3, [#allocation3]  }
 0x120   :  { %360 = dma.done.wait [#allocation3], 64  }
 0x121   :  { %361 = vsyncadd [#allocation3], 4294967232 }
 0x122   :  { %226 = vsyncpa [#allocation3], 1 }

</bundles_post_ra>
